<compile_context>
chip_gen: v5e
topology: v5e:2x2
jax: 0.10.0
libtpu: 0.0.40
codegen_flags: <defaults>
</compile_context>

<pallas_src>
import math

import jax
import jax.numpy as jnp
from jax.experimental import pallas as pl
from jax.experimental.pallas import tpu as pltpu


def _round_up(n: int, m: int) -> int:
    return ((n + m - 1) // m) * m


def _round_down(n: int, m: int) -> int:
    return (n // m) * m


def _tpu_generation():
    """Returns (per-buffer VMEM tile budget in bytes, TensorCores per chip)."""
    try:
        kind = jax.devices()[0].device_kind.lower()
    except Exception:
        kind = ""
    if "v7" in kind:
        # v7x: 3.2 TB/s HBM -> bigger tiles; 4 x 6 MiB buffers < 32 MiB scoped.
        return 6 * 1024 * 1024, 2
    if "v6" in kind:
        return 4 * 1024 * 1024, 1
    # v5e and unknown chips: conservative (16 MiB default scoped VMEM).
    return 2 * 1024 * 1024, 1


def _prelu_scalar_kernel(alpha_ref, x_ref, o_ref):
    # alpha_ref: (1,) f32 scalar in SMEM; x_ref / o_ref: (bm, bl) VMEM tiles.
    x = x_ref[...]
    a = alpha_ref[0]
    o_ref[...] = jnp.where(x > 0, x, a * x).astype(o_ref.dtype)


def _prelu_row_kernel(x_ref, alpha_ref, o_ref):
    # x_ref / o_ref: (bm, bl) VMEM tiles; alpha_ref: (1, bl) resident f32 row.
    x = x_ref[...]
    a = alpha_ref[...]
    o_ref[...] = jnp.where(x > 0, x, a * x).astype(o_ref.dtype)


def _pick_tiles(rows, lane, itemsize, sub, budget, num_tc):
    """Pick (bm, bl, grid) for a (rows, lane) elementwise problem."""
    # Lane-axis block: full lane if a `sub`-row slab fits the budget,
    # otherwise a 128-multiple chunk (lane-axis grid for pathological widths).
    max_bl = max(128, _round_down(budget // (sub * itemsize), 128))
    bl = lane if lane <= max_bl else max_bl
    grid_l = pl.cdiv(lane, bl)

    # Row-axis block: as many rows as the budget allows, rounded to `sub`.
    row_bytes = bl * itemsize
    bm = max(sub, _round_down(budget // row_bytes, sub))
    bm = min(bm, _round_up(rows, sub))
    # Megacore (v7x): keep >= 2*num_tc total grid steps so both TCs get work.
    if num_tc > 1:
        min_steps = 2 * num_tc
        if grid_l < min_steps:
            needed_m = pl.cdiv(min_steps, grid_l)
            bm = min(bm, max(sub, _round_up(pl.cdiv(rows, needed_m), sub)))
    if rows < sub:
        bm = rows  # block == full dim (explicitly allowed), avoid oversize block
    grid_m = pl.cdiv(rows, bm)
    return bm, bl, (grid_m, grid_l)


def prelu(x, alpha):
    """PReLU with the same (trailing-axis) broadcast semantics as the module.

    x:     arbitrary-rank array (e.g. NCHW).
    alpha: shape (num_parameters,); num_parameters must be 1 or x.shape[-1].
    """
    orig_shape = x.shape
    dtype = x.dtype
    total = x.size
    if total == 0:
        return x

    itemsize = jnp.dtype(dtype).itemsize
    # Sublane packing alignment: 8 rows for f32, 16 for bf16, 32 for int8/fp8.
    sub = 8 * max(1, 4 // itemsize)

    num_parameters = alpha.shape[0]
    W = orig_shape[-1] if len(orig_shape) else 1
    alpha_f32 = alpha.astype(jnp.float32)  # keep f32 param precision in the mul

    budget, num_tc = _tpu_generation()
    compiler_params = pltpu.CompilerParams(
        dimension_semantics=("parallel", "parallel"))

    if num_parameters == 1:
        # ---- scalar-alpha path: copy-free (rows, lane) re-view --------------
        shape = orig_shape if len(orig_shape) else (1,)
        lane, k = 1, len(shape)
        # Fold trailing dims until the lane axis is a multiple of 128 and
        # >= 512 (lane-dense, full-width vst), or everything is folded.
        for d in reversed(shape):
            lane *= d
            k -= 1
            if lane % 128 == 0 and lane >= 512:
                break
        if lane % 128 != 0:
            # No 128-divisible suffix exists: fold up to roughly one budget
            # row instead.  Final lane block's store is masked, but HBM
            # traffic stays a single pass (no pad / slice copies).
            lane, k = 1, len(shape)
            max_lane = max(1, budget // (sub * itemsize))
            for d in reversed(shape):
                if lane > 1 and lane * d > max_lane:
                    break
                lane *= d
                k -= 1
        rows = total // lane
        x2 = x.reshape(rows, lane)

        bm, bl, grid = _pick_tiles(rows, lane, itemsize, sub, budget, num_tc)

        out2 = pl.pallas_call(
            _prelu_scalar_kernel,
            out_shape=jax.ShapeDtypeStruct((rows, lane), dtype),
            grid=grid,
            in_specs=[
                pl.BlockSpec(memory_space=pltpu.MemorySpace.SMEM),  # alpha (1,)
                pl.BlockSpec((bm, bl), lambda i, j: (i, j)),        # x tile
            ],
            out_specs=pl.BlockSpec((bm, bl), lambda i, j: (i, j)),
            compiler_params=compiler_params,
        )(alpha_f32, x2)
        return out2.reshape(orig_shape)

    if num_parameters != W:
        raise ValueError(
            f"alpha length {num_parameters} is not broadcastable against "
            f"x.shape[-1]={W}")

    # ---- per-channel (last-axis) path --------------------------------------
    rows = total // W
    if W % 128 == 0:
        r = 1                                   # already lane-dense, no fold
    else:
        r = 128 // math.gcd(W, 128)             # smallest r with (r*W) % 128 == 0
        while r * W < 512 and rows % (2 * r) == 0:
            r *= 2                              # widen toward >=512 lanes
        if rows % r != 0:
            # A copy-free fold is impossible; keep lane = W (final lane block
            # store is masked) rather than pad+slice, which triples traffic.
            r = 1
    lane = r * W
    rows2 = rows // r
    x2 = x.reshape(rows2, lane)
    alpha_row = (jnp.tile(alpha_f32, r) if r > 1 else alpha_f32).reshape(1, lane)

    bm, bl, grid = _pick_tiles(rows2, lane, itemsize, sub, budget, num_tc)

    out2 = pl.pallas_call(
        _prelu_row_kernel,
        out_shape=jax.ShapeDtypeStruct((rows2, lane), dtype),
        grid=grid,
        in_specs=[
            pl.BlockSpec((bm, bl), lambda i, j: (i, j)),  # x tile
            pl.BlockSpec((1, bl), lambda i, j: (0, j)),   # alpha lane chunk (resident)
        ],
        out_specs=pl.BlockSpec((bm, bl), lambda i, j: (i, j)),
        compiler_params=compiler_params,
    )(x2, alpha_row)
    return out2.reshape(orig_shape)


if __name__ == "__main__":
    key = jax.random.PRNGKey(0)
    x = jax.random.normal(key, (2, 4, 16, 16), dtype=jnp.float32)

    # num_parameters=1, init=0.25 (PReLU() defaults) — scalar-alpha path.
    alpha1 = jnp.full((1,), 0.25, dtype=jnp.float32)
    y1 = jax.block_until_ready(prelu(x, alpha1))
    ref1 = jnp.where(x > 0, x, alpha1 * x)
    assert y1.shape == x.shape
    assert jnp.allclose(y1, ref1, atol=1e-6, rtol=1e-6)

    # num_parameters == x.shape[-1] — per-lane alpha path.
    alphaW = jnp.linspace(0.05, 0.5, x.shape[-1], dtype=jnp.float32)
    yW = jax.block_until_ready(prelu(x, alphaW))
    refW = jnp.where(x > 0, x, alphaW * x)
    assert jnp.allclose(yW, refW, atol=1e-6, rtol=1e-6)

    print("KERNEL_OK")
</pallas_src>

<mosaic_0001>
module attributes {stable_mosaic.version = 11 : i64} {
  func.func @_prelu_scalar_kernel(%arg0: i32, %arg1: i32, %arg2: memref<1xf32, #tpu.memory_space<smem>>, %arg3: memref<2x1024xf32, #tpu.memory_space<vmem>>, %arg4: memref<2x1024xf32, #tpu.memory_space<vmem>>) attributes {dimension_semantics = [#tpu.dimension_semantics<parallel>, #tpu.dimension_semantics<parallel>], iteration_bounds = array<i64: 1, 1>, scalar_prefetch = 0 : i64, scratch_operands = 0 : i64, tpu.core_type = #tpu.core_type<tc>, window_params = [{transform_indices = @transform_0, window_bounds = array<i64: 1>}, {transform_indices = @transform_1, window_bounds = array<i64: 2, 1024>}, {transform_indices = @transform_2, window_bounds = array<i64: 2, 1024>}]} {
    %c0 = arith.constant 0 : index
    %c0_0 = arith.constant 0 : index
    %0 = vector.load %arg3[%c0, %c0_0] : memref<2x1024xf32, #tpu.memory_space<vmem>>, vector<2x1024xf32>
    %c0_1 = arith.constant 0 : index
    %1 = memref.load %arg2[%c0_1] : memref<1xf32, #tpu.memory_space<smem>>
    %cst = arith.constant 0.000000e+00 : f32
    %2 = vector.broadcast %cst : f32 to vector<2x1024xf32>
    %3 = arith.cmpf ogt, %0, %2 : vector<2x1024xf32>
    %4 = vector.broadcast %1 : f32 to vector<2x1024xf32>
    %5 = arith.mulf %4, %0 : vector<2x1024xf32>
    %6 = arith.select %3, %0, %5 : vector<2x1024xi1>, vector<2x1024xf32>
    %c0_2 = arith.constant 0 : index
    %c0_3 = arith.constant 0 : index
    %7 = vector.load %arg4[%c0_2, %c0_3] : memref<2x1024xf32, #tpu.memory_space<vmem>>, vector<2x1024xf32>
    tpu.vector_store %arg4[%c0_2, %c0_3], %6 {strides = array<i32>} : memref<2x1024xf32, #tpu.memory_space<vmem>>, vector<2x1024xf32>,
    return
  }
  func.func @transform_0(%arg0: i32, %arg1: i32) -> i32 {
    %c0_i32 = arith.constant 0 : i32
    %c0_i32_0 = arith.constant 0 : i32
    return %c0_i32 : i32
  }
  func.func @transform_1(%arg0: i32, %arg1: i32) -> (i32, i32) {
    %c0_i32 = arith.constant 0 : i32
    return %arg0, %arg1 : i32, i32
  }
  func.func @transform_2(%arg0: i32, %arg1: i32) -> (i32, i32) {
    %c0_i32 = arith.constant 0 : i32
    return %arg0, %arg1 : i32, i32
  }
}

</mosaic_0001>

<bundles_post_ra>
// kernel: tpu_custom_call.1
= control target key start
LH: loop header
LB: loop body
LE: loop exit
PB: predicated region body
PF: predicated region fallthrough
CT: control target
= control target key end

     0   :  { %8 = vsyncpa [#allocation4], 0  ;;  %s136_s0 = inlined_call_operand.<no memory space> [shape: f32[1], index: 0, kind: input, shape index: {}]   ;;  %s137_s1 = inlined_call_operand.hbm [shape: f32[2,1024], index: 1, kind: input, shape index: {}]   ;;  %s138_s2 = inlined_call_operand.hbm [shape: f32[2,1024], index: 2, kind: output, shape index: {}]  }
   0x1   :  { %9 = vsyncpa [#allocation5], 0  ;;  %s17_s11 = sshll.u32 %s137_s1, 4  ;;  %s110_s12 = smov [#allocation3]   ;;  %s18_s11 = int_to_ptr.hbm [resolvable:$true] %s17_s11 }
   0x2   :  { %s19_s13 = sshll.u32 %s110_s12, 4  ;;  %s20_s13 = int_to_ptr.vmem [resolvable:$true] %s19_s13 }
   0x3   :  { %22 = dma.hbm_to_vmem [thread:$0]  %s18_s11, 256, %s20_s13, [#allocation4]  }
   0x4   :  { %106 = dma.done.wait [#allocation4], 256  }
   0x5   :  { %107 = vsyncadd [#allocation4], 4294967040  ;;  %v32_v0 = vstv %s136_s0  ;;  %v27_v1 = vld [vmem:[#allocation3] sm:$0xff]  ;;  %v28_v2 = vld [vmem:[#allocation3 + $0x8] sm:$0xff]  ;;  %s111_s16 = smov [#allocation6]   ;;  %s46_s20 = sshll.u32 %s138_s2, 4  ;;  %s47_s20 = int_to_ptr.hbm [resolvable:$true] %s46_s20 }
   0x6   :  { %s44_s17 = sshll.u32 %s111_s16, 4  ;;  %vm30_vm0 = vcmp.gt.f32.partialorder %v27_v1, 0.0  ;;  %v33_v3 = vmul.f32 %v32_v0, %v27_v1  ;;  %vm31_vm1 = vcmp.gt.f32.partialorder %v28_v2, 0.0  ;;  %v34_v4 = vmul.f32 %v32_v0, %v28_v2  ;;  %s45_s17 = int_to_ptr.vmem [resolvable:$true] %s44_s17 }
   0x8   :  { %v35_v5 = vsel %vm30_vm0, %v27_v1, %v33_v3  ;;  %v36_v6 = vsel %vm31_vm1, %v28_v2, %v34_v4 }
   0x9   :  { %37 = vst [vmem:[#allocation6] sm:$0xff] %v35_v5 }
   0xa   :  { %38 = vst [vmem:[#allocation6 + $0x8] sm:$0xff] %v36_v6 }
   0xb   :  { %49 = dma.vmem_to_hbm [thread:$0]  %s45_s17, 256, %s47_s20, [#allocation5]  }
   0xc   :  { %108 = dma.done.wait [#allocation5], 256  }
   0xd   :  { %109 = vsyncadd [#allocation5], 4294967040 }
   0xe   :  { %54 = vsyncpa [#allocation4], 1 }
   0xf   :  { %55 = vsyncpa [#allocation5], 1 }

</bundles_post_ra>
